<compile_context>
chip_gen: v7x
topology: tpu7x:2x2x1
jax: 0.10.0
libtpu: 0.0.40
codegen_flags: <defaults>
</compile_context>

<pallas_src>
import functools

import jax
import jax.numpy as jnp
from jax.experimental import pallas as pl
from jax.experimental.pallas import tpu as pltpu

EPS = 1e-5


# ------------------------------- kernels -------------------------------------

def _conv1_res_kernel(x_ref, w_ref, y1_ref, ps_ref, xpad_ref, *, cout):
    """Pass A: conv1 (3 taps fused into one im2col matmul); the residual 1x1
    projection is folded in as extra output columns (stats only).  Emits
    per-tile partial (sum, sum-of-squares) BN statistics."""
    tn, l, cin = x_ref.shape

    # Zero-padded copy of x along L in VMEM scratch.  Pad rows re-zeroed every
    # step (megacore-safe; cost is 2 tiny stores per step).
    xpad_ref[:, 0:1, :] = jnp.zeros((tn, 1, cin), xpad_ref.dtype)
    xpad_ref[:, l + 1:l + 2, :] = jnp.zeros((tn, 1, cin), xpad_ref.dtype)
    xpad_ref[:, 1:l + 1, :] = x_ref[...]

    # Single im2col LHS (rows, 3*Cin) -> one matmul (K = 3*Cin).
    lhs = jnp.concatenate(
        [xpad_ref[:, 0:l, :], xpad_ref[:, 1:l + 1, :], xpad_ref[:, 2:l + 2, :]],
        axis=-1).reshape(tn * l, 3 * cin)
    y = jnp.dot(lhs, w_ref[...], preferred_element_type=jnp.float32)  # (rows, cw)

    y1_ref[...] = y[:, :cout].reshape(tn, l, cout).astype(y1_ref.dtype)
    # Partial stats for BN1 (first Cout cols) and residual BN (remaining cols).
    ps_ref[:, 0:1, :] = jnp.sum(y, axis=0, keepdims=True)[None]
    ps_ref[:, 1:2, :] = jnp.sum(y * y, axis=0, keepdims=True)[None]


def _bn1_relu_conv2_kernel(y1_ref, sc1_ref, sh1_ref, w2_ref,
                           y2_ref, ps_ref, hpad_ref):
    """Pass B: BN1 scale/shift + ReLU fused with conv2 (single im2col matmul,
    K = 3*C), plus per-tile partial BN2 statistics."""
    tn, l, c = y1_ref.shape
    h = jnp.maximum(
        y1_ref[...].astype(jnp.float32) * sc1_ref[...] + sh1_ref[...], 0.0)

    hpad_ref[:, 0:1, :] = jnp.zeros((tn, 1, c), hpad_ref.dtype)
    hpad_ref[:, l + 1:l + 2, :] = jnp.zeros((tn, 1, c), hpad_ref.dtype)
    hpad_ref[:, 1:l + 1, :] = h.astype(hpad_ref.dtype)

    lhs = jnp.concatenate(
        [hpad_ref[:, 0:l, :], hpad_ref[:, 1:l + 1, :], hpad_ref[:, 2:l + 2, :]],
        axis=-1).reshape(tn * l, 3 * c)
    acc = jnp.dot(lhs, w2_ref[...], preferred_element_type=jnp.float32)

    y2_ref[...] = acc.reshape(tn, l, c).astype(y2_ref.dtype)
    ps_ref[:, 0:1, :] = jnp.sum(acc, axis=0, keepdims=True)[None]
    ps_ref[:, 1:2, :] = jnp.sum(acc * acc, axis=0, keepdims=True)[None]


def _bn2_res_relu_kernel(*refs, has_proj):
    """Pass C: BN2 scale/shift + residual path (recomputed 1x1 projection + BN,
    or identity) + add + ReLU.  Output aliases y2's HBM buffer."""
    if has_proj:
        y2_ref, x_ref, wr_ref, sc2_ref, sh2_ref, scr_ref, shr_ref, o_ref = refs
    else:
        y2_ref, x_ref, sc2_ref, sh2_ref, o_ref = refs
    tn, l, c = y2_ref.shape

    y2 = y2_ref[...].astype(jnp.float32) * sc2_ref[...] + sh2_ref[...]
    if has_proj:
        cin = x_ref.shape[-1]
        r = jnp.dot(x_ref[...].reshape(tn * l, cin), wr_ref[...],
                    preferred_element_type=jnp.float32).reshape(tn, l, c)
        r = r * scr_ref[...] + shr_ref[...]
    else:
        r = x_ref[...].astype(jnp.float32)
    o_ref[...] = jnp.maximum(y2 + r, 0.0).astype(o_ref.dtype)


# ------------------------------- helpers --------------------------------------

def _scale_shift(sums, sumsqs, count, gamma, beta):
    """Per-channel BN scale/shift from accumulated sum / sum-of-squares."""
    mean = sums / count
    # TODO(synk): E[y^2]-mean^2 can lose precision for |mean| >> std; switch to a
    # Welford-style pass if BN statistics accuracy ever becomes a concern.
    var = jnp.maximum(sumsqs / count - mean * mean, 0.0)
    scale = gamma.astype(jnp.float32) * jax.lax.rsqrt(var + EPS)
    shift = beta.astype(jnp.float32) - mean * scale
    return scale.reshape(1, 1, -1), shift.reshape(1, 1, -1)


def _vmem_limit_bytes():
    """Generation-aware VMEM limit: ~75% of physical capacity, capped."""
    cap = 64 * 1024 * 1024
    try:
        cap = int(getattr(pltpu.get_tpu_info(), "vmem_capacity_bytes", cap))
    except Exception:
        pass
    return max(32 * 1024 * 1024, min(cap * 3 // 4, 100 * 1024 * 1024))


def _auto_batch_tile(n, l, channels, itemsize, budget_bytes):
    """Largest batch tile whose working set fits `budget_bytes`, targeting a
    matmul M dimension (tn*L) of up to ~1024 rows; prefers >= 2 grid steps when
    the per-step tiles are already large (megacore / pipelining)."""
    def per_tile_bytes(d):
        rows = d * l
        return (rows * channels * (8 * itemsize + 8)
                + d * (l + 2) * channels * itemsize)

    divisors = [d for d in range(1, n + 1) if n % d == 0]
    fitting = [d for d in divisors if per_tile_bytes(d) <= budget_bytes]
    if not fitting:
        return 1
    capped = [d for d in fitting if d * l <= 1024]
    tn = max(capped) if capped else min(fitting)
    multi = [d for d in fitting if n // d >= 2 and d * l >= 256]
    if n // tn < 2 and multi:
        tn = max(multi)
    return tn


# ------------------------------- wrapper --------------------------------------

def resblock_forward(x_ncl, params, *, has_proj=True,
                     compute_dtype=jnp.bfloat16, batch_tile=None):
    """x_ncl: (N, Cin, L) float32 (PyTorch NCL layout). Returns (N, Cout, L)."""
    N, Cin, L = x_ncl.shape
    Cout = params["w1"].shape[0]
    if not has_proj:
        assert Cin == Cout, "identity skip requires num_ins == num_outs"

    itemsize = jnp.dtype(compute_dtype).itemsize
    vmem_limit = _vmem_limit_bytes()
    if batch_tile is None:
        batch_tile = _auto_batch_tile(N, L, max(Cin, Cout), itemsize,
                                      vmem_limit // 2)
    tn = batch_tile if (batch_tile >= 1 and N % batch_tile == 0) else 1
    nt = N // tn
    cw = 2 * Cout if has_proj else Cout
    count = jnp.float32(N * L)

    # Layout prep: NCL -> NLC once; im2col happens inside the kernels.
    x_nlc = jnp.transpose(x_ncl, (0, 2, 1)).astype(compute_dtype)      # (N,L,Cin)

    # Weights: (Cout,Cin,3) -> (3Cin,Cout); residual 1x1 folded into extra
    # columns (centre-tap rows) of the pass-A matmul for its BN statistics.
    # Conv biases b1/b2/br are dropped (cancelled by training-mode BN mean).
    w1cat = jnp.transpose(params["w1"], (2, 1, 0)).reshape(3 * Cin, Cout)
    wr_c = None
    if has_proj:
        wr = jnp.transpose(params["wr"][:, :, 0], (1, 0))              # (Cin,Cout)
        zero = jnp.zeros((Cin, Cout), jnp.float32)
        wbig = jnp.concatenate(
            [w1cat, jnp.concatenate([zero, wr, zero], axis=0)], axis=1)
        wr_c = wr.astype(compute_dtype)
    else:
        wbig = w1cat
    wbig = wbig.astype(compute_dtype)                                  # (3Cin,cw)
    w2 = jnp.transpose(params["w2"], (2, 1, 0)).reshape(3 * Cout, Cout)
    w2 = w2.astype(compute_dtype)                                      # (3Cout,Cout)

    cparams = pltpu.CompilerParams(dimension_semantics=("parallel",),
                                   vmem_limit_bytes=vmem_limit)

    x_spec = pl.BlockSpec((tn, L, Cin), lambda i: (i, 0, 0))
    act_spec = pl.BlockSpec((tn, L, Cout), lambda i: (i, 0, 0))
    vec_spec = pl.BlockSpec((1, 1, Cout), lambda i: (0, 0, 0))
    wbig_spec = pl.BlockSpec((3 * Cin, cw), lambda i: (0, 0))
    w2_spec = pl.BlockSpec((3 * Cout, Cout), lambda i: (0, 0))
    wr_spec = pl.BlockSpec((Cin, Cout), lambda i: (0, 0))
    psA_spec = pl.BlockSpec((1, 2, cw), lambda i: (i, 0, 0))
    psB_spec = pl.BlockSpec((1, 2, Cout), lambda i: (i, 0, 0))

    # ---------------- pass A: conv1 (+ fused residual projection stats) --------
    y1, psA = pl.pallas_call(
        functools.partial(_conv1_res_kernel, cout=Cout),
        grid=(nt,),
        in_specs=[x_spec, wbig_spec],
        out_specs=(act_spec, psA_spec),
        out_shape=(jax.ShapeDtypeStruct((N, L, Cout), compute_dtype),
                   jax.ShapeDtypeStruct((nt, 2, cw), jnp.float32)),
        scratch_shapes=[pltpu.VMEM((tn, L + 2, Cin), compute_dtype)],
        compiler_params=cparams,
    )(x_nlc, wbig)

    sA = jnp.sum(psA, axis=0)                                          # (2, cw)
    sc1, sh1 = _scale_shift(sA[0, :Cout], sA[1, :Cout], count,
                            params["g1"], params["be1"])
    if has_proj:
        scr, shr = _scale_shift(sA[0, Cout:], sA[1, Cout:], count,
                                params["gr"], params["ber"])

    # ---------------- pass B: bn1 + relu + conv2 + stats -----------------------
    y2, psB = pl.pallas_call(
        _bn1_relu_conv2_kernel,
        grid=(nt,),
        in_specs=[act_spec, vec_spec, vec_spec, w2_spec],
        out_specs=(act_spec, psB_spec),
        out_shape=(jax.ShapeDtypeStruct((N, L, Cout), compute_dtype),
                   jax.ShapeDtypeStruct((nt, 2, Cout), jnp.float32)),
        scratch_shapes=[pltpu.VMEM((tn, L + 2, Cout), compute_dtype)],
        compiler_params=cparams,
    )(y1, sc1, sh1, w2)

    sB = jnp.sum(psB, axis=0)
    sc2, sh2 = _scale_shift(sB[0], sB[1], count, params["g2"], params["be2"])

    # ---------------- pass C: bn2 + residual + relu -----------------------------
    if has_proj:
        inputs = (y2, x_nlc, wr_c, sc2, sh2, scr, shr)
        in_specs = [act_spec, x_spec, wr_spec,
                    vec_spec, vec_spec, vec_spec, vec_spec]
    else:
        inputs = (y2, x_nlc, sc2, sh2)
        in_specs = [act_spec, x_spec, vec_spec, vec_spec]

    out_nlc = pl.pallas_call(
        functools.partial(_bn2_res_relu_kernel, has_proj=has_proj),
        grid=(nt,),
        in_specs=in_specs,
        out_specs=act_spec,
        out_shape=jax.ShapeDtypeStruct((N, L, Cout), compute_dtype),
        input_output_aliases={0: 0},          # reuse y2's buffer for the output
        compiler_params=cparams,
    )(*inputs)

    return jnp.transpose(out_nlc, (0, 2, 1)).astype(x_ncl.dtype)       # back NCL


# ------------------------- pure-JAX reference (NCL) ---------------------------

def _conv1d_ncl(x, w, b, stride=1, pad=1):
    y = jax.lax.conv_general_dilated(
        x, w, window_strides=(stride,), padding=[(pad, pad)],
        dimension_numbers=("NCH", "OIH", "NCH"))
    return y + b.reshape(1, -1, 1)


def _bn_ncl(y, g, b):
    mean = jnp.mean(y, axis=(0, 2), keepdims=True)
    var = jnp.mean((y - mean) ** 2, axis=(0, 2), keepdims=True)
    return g.reshape(1, -1, 1) * (y - mean) / jnp.sqrt(var + EPS) + b.reshape(1, -1, 1)


def resblock_ref(x_ncl, p, has_proj=True):
    h = jax.nn.relu(_bn_ncl(_conv1d_ncl(x_ncl, p["w1"], p["b1"]), p["g1"], p["be1"]))
    h = _bn_ncl(_conv1d_ncl(h, p["w2"], p["b2"]), p["g2"], p["be2"])
    if has_proj:
        r = _bn_ncl(_conv1d_ncl(x_ncl, p["wr"], p["br"], pad=0), p["gr"], p["ber"])
    else:
        r = x_ncl
    return jax.nn.relu(h + r)


# ----------------------------------- demo --------------------------------------

def _make_params(key, cin, cout):
    ks = jax.random.split(key, 12)
    return {
        "w1": 0.2 * jax.random.normal(ks[0], (cout, cin, 3), jnp.float32),
        "b1": 0.1 * jax.random.normal(ks[1], (cout,), jnp.float32),
        "g1": 1.0 + 0.1 * jax.random.normal(ks[2], (cout,), jnp.float32),
        "be1": 0.1 * jax.random.normal(ks[3], (cout,), jnp.float32),
        "w2": 0.2 * jax.random.normal(ks[4], (cout, cout, 3), jnp.float32),
        "b2": 0.1 * jax.random.normal(ks[5], (cout,), jnp.float32),
        "g2": 1.0 + 0.1 * jax.random.normal(ks[6], (cout,), jnp.float32),
        "be2": 0.1 * jax.random.normal(ks[7], (cout,), jnp.float32),
        "wr": 0.2 * jax.random.normal(ks[8], (cout, cin, 1), jnp.float32),
        "br": 0.1 * jax.random.normal(ks[9], (cout,), jnp.float32),
        "gr": 1.0 + 0.1 * jax.random.normal(ks[10], (cout,), jnp.float32),
        "ber": 0.1 * jax.random.normal(ks[11], (cout,), jnp.float32),
    }


if __name__ == "__main__":
    key = jax.random.PRNGKey(0)
    kp, kx, kp2, kx2 = jax.random.split(key, 4)

    # Projection-residual block: num_ins != num_outs.
    N, Cin, Cout, L = 2, 4, 8, 16
    params = _make_params(kp, Cin, Cout)
    x = jax.random.normal(kx, (N, Cin, L), jnp.float32)
    ref = jax.block_until_ready(resblock_ref(x, params, has_proj=True))

    fwd_f32 = jax.jit(functools.partial(resblock_forward, has_proj=True,
                                        compute_dtype=jnp.float32))
    out_f32 = jax.block_until_ready(fwd_f32(x, params))
    assert out_f32.shape == (N, Cout, L), out_f32.shape
    err_f32 = float(jnp.max(jnp.abs(out_f32 - ref)))
    assert err_f32 < 1e-3, err_f32

    fwd_bf16 = jax.jit(functools.partial(resblock_forward, has_proj=True,
                                         compute_dtype=jnp.bfloat16))
    out_bf16 = jax.block_until_ready(fwd_bf16(x, params))
    err_bf16 = float(jnp.max(jnp.abs(out_bf16 - ref)))
    assert err_bf16 < 2.5e-1, err_bf16

    # Identity-residual block: num_ins == num_outs, stride == 1.
    C2 = 8
    params2 = _make_params(kp2, C2, C2)
    x2 = jax.random.normal(kx2, (N, C2, L), jnp.float32)
    ref2 = jax.block_until_ready(resblock_ref(x2, params2, has_proj=False))
    fwd_id = jax.jit(functools.partial(resblock_forward, has_proj=False,
                                       compute_dtype=jnp.float32))
    out2 = jax.block_until_ready(fwd_id(x2, params2))
    err_id = float(jnp.max(jnp.abs(out2 - ref2)))
    assert err_id < 1e-3, err_id

    print("KERNEL_OK")
</pallas_src>

<mosaic_0001>
module attributes {stable_mosaic.version = 11 : i64} {
  func.func @_conv1_res_kernel(%arg0: i32, %arg1: memref<2x16x4xf32, #tpu.memory_space<vmem>>, %arg2: memref<12x16xf32, #tpu.memory_space<vmem>>, %arg3: memref<2x16x8xf32, #tpu.memory_space<vmem>>, %arg4: memref<1x2x16xf32, #tpu.memory_space<vmem>>, %arg5: memref<2x18x4xf32, #tpu.memory_space<vmem>>) attributes {dimension_semantics = [#tpu.dimension_semantics<parallel>], iteration_bounds = array<i64: 1>, scalar_prefetch = 0 : i64, scratch_operands = 1 : i64, tpu.core_type = #tpu.core_type<tc>, window_params = [{transform_indices = @transform_0, window_bounds = array<i64: 2, 16, 4>}, {pipeline_mode = #tpu.pipeline_mode<synchronous>, transform_indices = @transform_1, window_bounds = array<i64: 12, 16>}, {transform_indices = @transform_2, window_bounds = array<i64: 2, 16, 8>}, {transform_indices = @transform_3, window_bounds = array<i64: 1, 2, 16>}]} {
    %cst = arith.constant 0.000000e+00 : f32
    %0 = vector.broadcast %cst : f32 to vector<2x1x4xf32>
    %c0 = arith.constant 0 : index
    %c0_0 = arith.constant 0 : index
    %c0_1 = arith.constant 0 : index
    %1 = vector.load %arg5[%c0, %c0_0, %c0_1] : memref<2x18x4xf32, #tpu.memory_space<vmem>>, vector<2x1x4xf32>
    tpu.vector_store %arg5[%c0, %c0_0, %c0_1], %0 {strides = array<i32>} : memref<2x18x4xf32, #tpu.memory_space<vmem>>, vector<2x1x4xf32>,
    %cst_2 = arith.constant 0.000000e+00 : f32
    %2 = vector.broadcast %cst_2 : f32 to vector<2x1x4xf32>
    %c0_3 = arith.constant 0 : index
    %c17 = arith.constant 17 : index
    %c0_4 = arith.constant 0 : index
    %3 = vector.load %arg5[%c0_3, %c17, %c0_4] : memref<2x18x4xf32, #tpu.memory_space<vmem>>, vector<2x1x4xf32>
    tpu.vector_store %arg5[%c0_3, %c17, %c0_4], %2 {strides = array<i32>} : memref<2x18x4xf32, #tpu.memory_space<vmem>>, vector<2x1x4xf32>,
    %c0_5 = arith.constant 0 : index
    %c0_6 = arith.constant 0 : index
    %c0_7 = arith.constant 0 : index
    %4 = vector.load %arg1[%c0_5, %c0_6, %c0_7] : memref<2x16x4xf32, #tpu.memory_space<vmem>>, vector<2x16x4xf32>
    %c0_8 = arith.constant 0 : index
    %c1 = arith.constant 1 : index
    %c0_9 = arith.constant 0 : index
    %5 = vector.load %arg5[%c0_8, %c1, %c0_9] : memref<2x18x4xf32, #tpu.memory_space<vmem>>, vector<2x16x4xf32>
    tpu.vector_store %arg5[%c0_8, %c1, %c0_9], %4 {strides = array<i32>} : memref<2x18x4xf32, #tpu.memory_space<vmem>>, vector<2x16x4xf32>,
    %c0_10 = arith.constant 0 : index
    %c0_11 = arith.constant 0 : index
    %c0_12 = arith.constant 0 : index
    %6 = vector.load %arg5[%c0_10, %c0_11, %c0_12] : memref<2x18x4xf32, #tpu.memory_space<vmem>>, vector<2x16x4xf32>
    %c0_13 = arith.constant 0 : index
    %c1_14 = arith.constant 1 : index
    %c0_15 = arith.constant 0 : index
    %7 = vector.load %arg5[%c0_13, %c1_14, %c0_15] : memref<2x18x4xf32, #tpu.memory_space<vmem>>, vector<2x16x4xf32>
    %c0_16 = arith.constant 0 : index
    %c2 = arith.constant 2 : index
    %c0_17 = arith.constant 0 : index
    %8 = vector.load %arg5[%c0_16, %c2, %c0_17] : memref<2x18x4xf32, #tpu.memory_space<vmem>>, vector<2x16x4xf32>
    %9 = tpu.concatenate %6, %7, %8 in 2 : vector<2x16x4xf32>, vector<2x16x4xf32>, vector<2x16x4xf32> -> vector<2x16x12xf32>
    %10 = vector.shape_cast %9 : vector<2x16x12xf32> to vector<32x12xf32>
    %c0_18 = arith.constant 0 : index
    %c0_19 = arith.constant 0 : index
    %11 = vector.load %arg2[%c0_18, %c0_19] : memref<12x16xf32, #tpu.memory_space<vmem>>, vector<12x16xf32>
    %cst_20 = arith.constant dense<0.000000e+00> : vector<32x16xf32>
    %12 = tpu.matmul %10, %11, %cst_20 {dimension_numbers = #tpu.dot_dimension_numbers<[1], [0], [0], [1], [0, 0, 1, 1], [], []>} : vector<32x12xf32>, vector<12x16xf32>, vector<32x16xf32> -> vector<32x16xf32>
    %13 = vector.extract_strided_slice %12 {offsets = [0, 0], sizes = [32, 8], strides = [1, 1]} : vector<32x16xf32> to vector<32x8xf32>
    %14 = vector.shape_cast %13 : vector<32x8xf32> to vector<2x16x8xf32>
    %c0_21 = arith.constant 0 : index
    %c0_22 = arith.constant 0 : index
    %c0_23 = arith.constant 0 : index
    %15 = vector.load %arg3[%c0_21, %c0_22, %c0_23] : memref<2x16x8xf32, #tpu.memory_space<vmem>>, vector<2x16x8xf32>
    tpu.vector_store %arg3[%c0_21, %c0_22, %c0_23], %14 {strides = array<i32>} : memref<2x16x8xf32, #tpu.memory_space<vmem>>, vector<2x16x8xf32>,
    %cst_24 = arith.constant dense<0.000000e+00> : vector<16xf32>
    %16 = vector.multi_reduction <add>, %12, %cst_24 [0] : vector<32x16xf32> to vector<16xf32>
    %17 = vector.shape_cast %16 : vector<16xf32> to vector<1x16xf32>
    %18 = vector.shape_cast %17 : vector<1x16xf32> to vector<1x1x16xf32>
    %c0_25 = arith.constant 0 : index
    %c0_26 = arith.constant 0 : index
    %c0_27 = arith.constant 0 : index
    %19 = vector.load %arg4[%c0_25, %c0_26, %c0_27] : memref<1x2x16xf32, #tpu.memory_space<vmem>>, vector<1x1x16xf32>
    tpu.vector_store %arg4[%c0_25, %c0_26, %c0_27], %18 {strides = array<i32>} : memref<1x2x16xf32, #tpu.memory_space<vmem>>, vector<1x1x16xf32>,
    %20 = arith.mulf %12, %12 : vector<32x16xf32>
    %cst_28 = arith.constant dense<0.000000e+00> : vector<16xf32>
    %21 = vector.multi_reduction <add>, %20, %cst_28 [0] : vector<32x16xf32> to vector<16xf32>
    %22 = vector.shape_cast %21 : vector<16xf32> to vector<1x16xf32>
    %23 = vector.shape_cast %22 : vector<1x16xf32> to vector<1x1x16xf32>
    %c0_29 = arith.constant 0 : index
    %c1_30 = arith.constant 1 : index
    %c0_31 = arith.constant 0 : index
    %24 = vector.load %arg4[%c0_29, %c1_30, %c0_31] : memref<1x2x16xf32, #tpu.memory_space<vmem>>, vector<1x1x16xf32>
    tpu.vector_store %arg4[%c0_29, %c1_30, %c0_31], %23 {strides = array<i32>} : memref<1x2x16xf32, #tpu.memory_space<vmem>>, vector<1x1x16xf32>,
    return
  }
  func.func @transform_0(%arg0: i32) -> (i32, i32, i32) {
    %c0_i32 = arith.constant 0 : i32
    %c0_i32_0 = arith.constant 0 : i32
    %c0_i32_1 = arith.constant 0 : i32
    return %arg0, %c0_i32, %c0_i32_0 : i32, i32, i32
  }
  func.func @transform_1(%arg0: i32) -> (i32, i32) {
    %c0_i32 = arith.constant 0 : i32
    %c0_i32_0 = arith.constant 0 : i32
    %c0_i32_1 = arith.constant 0 : i32
    return %c0_i32, %c0_i32_0 : i32, i32
  }
  func.func @transform_2(%arg0: i32) -> (i32, i32, i32) {
    %c0_i32 = arith.constant 0 : i32
    %c0_i32_0 = arith.constant 0 : i32
    %c0_i32_1 = arith.constant 0 : i32
    return %arg0, %c0_i32, %c0_i32_0 : i32, i32, i32
  }
  func.func @transform_3(%arg0: i32) -> (i32, i32, i32) {
    %c0_i32 = arith.constant 0 : i32
    %c0_i32_0 = arith.constant 0 : i32
    %c0_i32_1 = arith.constant 0 : i32
    return %arg0, %c0_i32, %c0_i32_0 : i32, i32, i32
  }
}

module attributes {stable_mosaic.version = 11 : i64} {
  func.func @_bn2_res_relu_kernel(%arg0: i32, %arg1: memref<2x16x8xf32, #tpu.memory_space<vmem>>, %arg2: memref<2x16x4xf32, #tpu.memory_space<vmem>>, %arg3: memref<4x8xf32, #tpu.memory_space<vmem>>, %arg4: memref<1x1x8xf32, #tpu.memory_space<vmem>>, %arg5: memref<1x1x8xf32, #tpu.memory_space<vmem>>, %arg6: memref<1x1x8xf32, #tpu.memory_space<vmem>>, %arg7: memref<1x1x8xf32, #tpu.memory_space<vmem>>, %arg8: memref<2x16x8xf32, #tpu.memory_space<vmem>>) attributes {dimension_semantics = [#tpu.dimension_semantics<parallel>], iteration_bounds = array<i64: 1>, scalar_prefetch = 0 : i64, scratch_operands = 0 : i64, tpu.core_type = #tpu.core_type<tc>, window_params = [{transform_indices = @transform_0, window_bounds = array<i64: 2, 16, 8>}, {transform_indices = @transform_1, window_bounds = array<i64: 2, 16, 4>}, {pipeline_mode = #tpu.pipeline_mode<synchronous>, transform_indices = @transform_2, window_bounds = array<i64: 4, 8>}, {pipeline_mode = #tpu.pipeline_mode<synchronous>, transform_indices = @transform_3, window_bounds = array<i64: 1, 1, 8>}, {pipeline_mode = #tpu.pipeline_mode<synchronous>, transform_indices = @transform_4, window_bounds = array<i64: 1, 1, 8>}, {pipeline_mode = #tpu.pipeline_mode<synchronous>, transform_indices = @transform_5, window_bounds = array<i64: 1, 1, 8>}, {pipeline_mode = #tpu.pipeline_mode<synchronous>, transform_indices = @transform_6, window_bounds = array<i64: 1, 1, 8>}, {transform_indices = @transform_7, window_bounds = array<i64: 2, 16, 8>}]} {
    %c0 = arith.constant 0 : index
    %c0_0 = arith.constant 0 : index
    %c0_1 = arith.constant 0 : index
    %0 = vector.load %arg1[%c0, %c0_0, %c0_1] : memref<2x16x8xf32, #tpu.memory_space<vmem>>, vector<2x16x8xf32>
    %c0_2 = arith.constant 0 : index
    %c0_3 = arith.constant 0 : index
    %c0_4 = arith.constant 0 : index
    %1 = vector.load %arg4[%c0_2, %c0_3, %c0_4] : memref<1x1x8xf32, #tpu.memory_space<vmem>>, vector<1x1x8xf32>
    %2 = vector.broadcast %1 : vector<1x1x8xf32> to vector<2x16x8xf32>
    %3 = arith.mulf %0, %2 : vector<2x16x8xf32>
    %c0_5 = arith.constant 0 : index
    %c0_6 = arith.constant 0 : index
    %c0_7 = arith.constant 0 : index
    %4 = vector.load %arg5[%c0_5, %c0_6, %c0_7] : memref<1x1x8xf32, #tpu.memory_space<vmem>>, vector<1x1x8xf32>
    %5 = vector.broadcast %4 : vector<1x1x8xf32> to vector<2x16x8xf32>
    %6 = arith.addf %3, %5 : vector<2x16x8xf32>
    %c0_8 = arith.constant 0 : index
    %c0_9 = arith.constant 0 : index
    %c0_10 = arith.constant 0 : index
    %7 = vector.load %arg2[%c0_8, %c0_9, %c0_10] : memref<2x16x4xf32, #tpu.memory_space<vmem>>, vector<2x16x4xf32>
    %8 = vector.shape_cast %7 : vector<2x16x4xf32> to vector<32x4xf32>
    %c0_11 = arith.constant 0 : index
    %c0_12 = arith.constant 0 : index
    %9 = vector.load %arg3[%c0_11, %c0_12] : memref<4x8xf32, #tpu.memory_space<vmem>>, vector<4x8xf32>
    %cst = arith.constant dense<0.000000e+00> : vector<32x8xf32>
    %10 = tpu.matmul %8, %9, %cst {dimension_numbers = #tpu.dot_dimension_numbers<[1], [0], [0], [1], [0, 0, 1, 1], [], []>} : vector<32x4xf32>, vector<4x8xf32>, vector<32x8xf32> -> vector<32x8xf32>
    %11 = vector.shape_cast %10 : vector<32x8xf32> to vector<2x16x8xf32>
    %c0_13 = arith.constant 0 : index
    %c0_14 = arith.constant 0 : index
    %c0_15 = arith.constant 0 : index
    %12 = vector.load %arg6[%c0_13, %c0_14, %c0_15] : memref<1x1x8xf32, #tpu.memory_space<vmem>>, vector<1x1x8xf32>
    %13 = vector.broadcast %12 : vector<1x1x8xf32> to vector<2x16x8xf32>
    %14 = arith.mulf %11, %13 : vector<2x16x8xf32>
    %c0_16 = arith.constant 0 : index
    %c0_17 = arith.constant 0 : index
    %c0_18 = arith.constant 0 : index
    %15 = vector.load %arg7[%c0_16, %c0_17, %c0_18] : memref<1x1x8xf32, #tpu.memory_space<vmem>>, vector<1x1x8xf32>
    %16 = vector.broadcast %15 : vector<1x1x8xf32> to vector<2x16x8xf32>
    %17 = arith.addf %14, %16 : vector<2x16x8xf32>
    %18 = arith.addf %6, %17 : vector<2x16x8xf32>
    %cst_19 = arith.constant 0.000000e+00 : f32
    %19 = vector.broadcast %cst_19 : f32 to vector<2x16x8xf32>
    %20 = arith.maximumf %18, %19 : vector<2x16x8xf32>
    %c0_20 = arith.constant 0 : index
    %c0_21 = arith.constant 0 : index
    %c0_22 = arith.constant 0 : index
    %21 = vector.load %arg8[%c0_20, %c0_21, %c0_22] : memref<2x16x8xf32, #tpu.memory_space<vmem>>, vector<2x16x8xf32>
    tpu.vector_store %arg8[%c0_20, %c0_21, %c0_22], %20 {strides = array<i32>} : memref<2x16x8xf32, #tpu.memory_space<vmem>>, vector<2x16x8xf32>,
    return
  }
  func.func @transform_0(%arg0: i32) -> (i32, i32, i32) {
    %c0_i32 = arith.constant 0 : i32
    %c0_i32_0 = arith.constant 0 : i32
    %c0_i32_1 = arith.constant 0 : i32
    return %arg0, %c0_i32, %c0_i32_0 : i32, i32, i32
  }
  func.func @transform_1(%arg0: i32) -> (i32, i32, i32) {
    %c0_i32 = arith.constant 0 : i32
    %c0_i32_0 = arith.constant 0 : i32
    %c0_i32_1 = arith.constant 0 : i32
    return %arg0, %c0_i32, %c0_i32_0 : i32, i32, i32
  }
  func.func @transform_2(%arg0: i32) -> (i32, i32) {
    %c0_i32 = arith.constant 0 : i32
    %c0_i32_0 = arith.constant 0 : i32
    %c0_i32_1 = arith.constant 0 : i32
    return %c0_i32, %c0_i32_0 : i32, i32
  }
  func.func @transform_3(%arg0: i32) -> (i32, i32, i32) {
    %c0_i32 = arith.constant 0 : i32
    %c0_i32_0 = arith.constant 0 : i32
    %c0_i32_1 = arith.constant 0 : i32
    %c0_i32_2 = arith.constant 0 : i32
    return %c0_i32, %c0_i32_0, %c0_i32_1 : i32, i32, i32
  }
  func.func @transform_4(%arg0: i32) -> (i32, i32, i32) {
    %c0_i32 = arith.constant 0 : i32
    %c0_i32_0 = arith.constant 0 : i32
    %c0_i32_1 = arith.constant 0 : i32
    %c0_i32_2 = arith.constant 0 : i32
    return %c0_i32, %c0_i32_0, %c0_i32_1 : i32, i32, i32
  }
  func.func @transform_5(%arg0: i32) -> (i32, i32, i32) {
    %c0_i32 = arith.constant 0 : i32
    %c0_i32_0 = arith.constant 0 : i32
    %c0_i32_1 = arith.constant 0 : i32
    %c0_i32_2 = arith.constant 0 : i32
    return %c0_i32, %c0_i32_0, %c0_i32_1 : i32, i32, i32
  }
  func.func @transform_6(%arg0: i32) -> (i32, i32, i32) {
    %c0_i32 = arith.constant 0 : i32
    %c0_i32_0 = arith.constant 0 : i32
    %c0_i32_1 = arith.constant 0 : i32
    %c0_i32_2 = arith.constant 0 : i32
    return %c0_i32, %c0_i32_0, %c0_i32_1 : i32, i32, i32
  }
  func.func @transform_7(%arg0: i32) -> (i32, i32, i32) {
    %c0_i32 = arith.constant 0 : i32
    %c0_i32_0 = arith.constant 0 : i32
    %c0_i32_1 = arith.constant 0 : i32
    return %arg0, %c0_i32, %c0_i32_0 : i32, i32, i32
  }
}

module attributes {stable_mosaic.version = 11 : i64} {
  func.func @_bn1_relu_conv2_kernel(%arg0: i32, %arg1: memref<2x16x8xf32, #tpu.memory_space<vmem>>, %arg2: memref<1x1x8xf32, #tpu.memory_space<vmem>>, %arg3: memref<1x1x8xf32, #tpu.memory_space<vmem>>, %arg4: memref<24x8xf32, #tpu.memory_space<vmem>>, %arg5: memref<2x16x8xf32, #tpu.memory_space<vmem>>, %arg6: memref<1x2x8xf32, #tpu.memory_space<vmem>>, %arg7: memref<2x18x8xf32, #tpu.memory_space<vmem>>) attributes {dimension_semantics = [#tpu.dimension_semantics<parallel>], iteration_bounds = array<i64: 1>, scalar_prefetch = 0 : i64, scratch_operands = 1 : i64, tpu.core_type = #tpu.core_type<tc>, window_params = [{transform_indices = @transform_0, window_bounds = array<i64: 2, 16, 8>}, {pipeline_mode = #tpu.pipeline_mode<synchronous>, transform_indices = @transform_1, window_bounds = array<i64: 1, 1, 8>}, {pipeline_mode = #tpu.pipeline_mode<synchronous>, transform_indices = @transform_2, window_bounds = array<i64: 1, 1, 8>}, {pipeline_mode = #tpu.pipeline_mode<synchronous>, transform_indices = @transform_3, window_bounds = array<i64: 24, 8>}, {transform_indices = @transform_4, window_bounds = array<i64: 2, 16, 8>}, {transform_indices = @transform_5, window_bounds = array<i64: 1, 2, 8>}]} {
    %c0 = arith.constant 0 : index
    %c0_0 = arith.constant 0 : index
    %c0_1 = arith.constant 0 : index
    %0 = vector.load %arg1[%c0, %c0_0, %c0_1] : memref<2x16x8xf32, #tpu.memory_space<vmem>>, vector<2x16x8xf32>
    %c0_2 = arith.constant 0 : index
    %c0_3 = arith.constant 0 : index
    %c0_4 = arith.constant 0 : index
    %1 = vector.load %arg2[%c0_2, %c0_3, %c0_4] : memref<1x1x8xf32, #tpu.memory_space<vmem>>, vector<1x1x8xf32>
    %2 = vector.broadcast %1 : vector<1x1x8xf32> to vector<2x16x8xf32>
    %3 = arith.mulf %0, %2 : vector<2x16x8xf32>
    %c0_5 = arith.constant 0 : index
    %c0_6 = arith.constant 0 : index
    %c0_7 = arith.constant 0 : index
    %4 = vector.load %arg3[%c0_5, %c0_6, %c0_7] : memref<1x1x8xf32, #tpu.memory_space<vmem>>, vector<1x1x8xf32>
    %5 = vector.broadcast %4 : vector<1x1x8xf32> to vector<2x16x8xf32>
    %6 = arith.addf %3, %5 : vector<2x16x8xf32>
    %cst = arith.constant 0.000000e+00 : f32
    %7 = vector.broadcast %cst : f32 to vector<2x16x8xf32>
    %8 = arith.maximumf %6, %7 : vector<2x16x8xf32>
    %cst_8 = arith.constant 0.000000e+00 : f32
    %9 = vector.broadcast %cst_8 : f32 to vector<2x1x8xf32>
    %c0_9 = arith.constant 0 : index
    %c0_10 = arith.constant 0 : index
    %c0_11 = arith.constant 0 : index
    %10 = vector.load %arg7[%c0_9, %c0_10, %c0_11] : memref<2x18x8xf32, #tpu.memory_space<vmem>>, vector<2x1x8xf32>
    tpu.vector_store %arg7[%c0_9, %c0_10, %c0_11], %9 {strides = array<i32>} : memref<2x18x8xf32, #tpu.memory_space<vmem>>, vector<2x1x8xf32>,
    %cst_12 = arith.constant 0.000000e+00 : f32
    %11 = vector.broadcast %cst_12 : f32 to vector<2x1x8xf32>
    %c0_13 = arith.constant 0 : index
    %c17 = arith.constant 17 : index
    %c0_14 = arith.constant 0 : index
    %12 = vector.load %arg7[%c0_13, %c17, %c0_14] : memref<2x18x8xf32, #tpu.memory_space<vmem>>, vector<2x1x8xf32>
    tpu.vector_store %arg7[%c0_13, %c17, %c0_14], %11 {strides = array<i32>} : memref<2x18x8xf32, #tpu.memory_space<vmem>>, vector<2x1x8xf32>,
    %c0_15 = arith.constant 0 : index
    %c1 = arith.constant 1 : index
    %c0_16 = arith.constant 0 : index
    %13 = vector.load %arg7[%c0_15, %c1, %c0_16] : memref<2x18x8xf32, #tpu.memory_space<vmem>>, vector<2x16x8xf32>
    tpu.vector_store %arg7[%c0_15, %c1, %c0_16], %8 {strides = array<i32>} : memref<2x18x8xf32, #tpu.memory_space<vmem>>, vector<2x16x8xf32>,
    %c0_17 = arith.constant 0 : index
    %c0_18 = arith.constant 0 : index
    %c0_19 = arith.constant 0 : index
    %14 = vector.load %arg7[%c0_17, %c0_18, %c0_19] : memref<2x18x8xf32, #tpu.memory_space<vmem>>, vector<2x16x8xf32>
    %c0_20 = arith.constant 0 : index
    %c1_21 = arith.constant 1 : index
    %c0_22 = arith.constant 0 : index
    %15 = vector.load %arg7[%c0_20, %c1_21, %c0_22] : memref<2x18x8xf32, #tpu.memory_space<vmem>>, vector<2x16x8xf32>
    %c0_23 = arith.constant 0 : index
    %c2 = arith.constant 2 : index
    %c0_24 = arith.constant 0 : index
    %16 = vector.load %arg7[%c0_23, %c2, %c0_24] : memref<2x18x8xf32, #tpu.memory_space<vmem>>, vector<2x16x8xf32>
    %17 = tpu.concatenate %14, %15, %16 in 2 : vector<2x16x8xf32>, vector<2x16x8xf32>, vector<2x16x8xf32> -> vector<2x16x24xf32>
    %18 = vector.shape_cast %17 : vector<2x16x24xf32> to vector<32x24xf32>
    %c0_25 = arith.constant 0 : index
    %c0_26 = arith.constant 0 : index
    %19 = vector.load %arg4[%c0_25, %c0_26] : memref<24x8xf32, #tpu.memory_space<vmem>>, vector<24x8xf32>
    %cst_27 = arith.constant dense<0.000000e+00> : vector<32x8xf32>
    %20 = tpu.matmul %18, %19, %cst_27 {dimension_numbers = #tpu.dot_dimension_numbers<[1], [0], [0], [1], [0, 0, 1, 1], [], []>} : vector<32x24xf32>, vector<24x8xf32>, vector<32x8xf32> -> vector<32x8xf32>
    %21 = vector.shape_cast %20 : vector<32x8xf32> to vector<2x16x8xf32>
    %c0_28 = arith.constant 0 : index
    %c0_29 = arith.constant 0 : index
    %c0_30 = arith.constant 0 : index
    %22 = vector.load %arg5[%c0_28, %c0_29, %c0_30] : memref<2x16x8xf32, #tpu.memory_space<vmem>>, vector<2x16x8xf32>
    tpu.vector_store %arg5[%c0_28, %c0_29, %c0_30], %21 {strides = array<i32>} : memref<2x16x8xf32, #tpu.memory_space<vmem>>, vector<2x16x8xf32>,
    %cst_31 = arith.constant dense<0.000000e+00> : vector<8xf32>
    %23 = vector.multi_reduction <add>, %20, %cst_31 [0] : vector<32x8xf32> to vector<8xf32>
    %24 = vector.shape_cast %23 : vector<8xf32> to vector<1x8xf32>
    %25 = vector.shape_cast %24 : vector<1x8xf32> to vector<1x1x8xf32>
    %c0_32 = arith.constant 0 : index
    %c0_33 = arith.constant 0 : index
    %c0_34 = arith.constant 0 : index
    %26 = vector.load %arg6[%c0_32, %c0_33, %c0_34] : memref<1x2x8xf32, #tpu.memory_space<vmem>>, vector<1x1x8xf32>
    tpu.vector_store %arg6[%c0_32, %c0_33, %c0_34], %25 {strides = array<i32>} : memref<1x2x8xf32, #tpu.memory_space<vmem>>, vector<1x1x8xf32>,
    %27 = arith.mulf %20, %20 : vector<32x8xf32>
    %cst_35 = arith.constant dense<0.000000e+00> : vector<8xf32>
    %28 = vector.multi_reduction <add>, %27, %cst_35 [0] : vector<32x8xf32> to vector<8xf32>
    %29 = vector.shape_cast %28 : vector<8xf32> to vector<1x8xf32>
    %30 = vector.shape_cast %29 : vector<1x8xf32> to vector<1x1x8xf32>
    %c0_36 = arith.constant 0 : index
    %c1_37 = arith.constant 1 : index
    %c0_38 = arith.constant 0 : index
    %31 = vector.load %arg6[%c0_36, %c1_37, %c0_38] : memref<1x2x8xf32, #tpu.memory_space<vmem>>, vector<1x1x8xf32>
    tpu.vector_store %arg6[%c0_36, %c1_37, %c0_38], %30 {strides = array<i32>} : memref<1x2x8xf32, #tpu.memory_space<vmem>>, vector<1x1x8xf32>,
    return
  }
  func.func @transform_0(%arg0: i32) -> (i32, i32, i32) {
    %c0_i32 = arith.constant 0 : i32
    %c0_i32_0 = arith.constant 0 : i32
    %c0_i32_1 = arith.constant 0 : i32
    return %arg0, %c0_i32, %c0_i32_0 : i32, i32, i32
  }
  func.func @transform_1(%arg0: i32) -> (i32, i32, i32) {
    %c0_i32 = arith.constant 0 : i32
    %c0_i32_0 = arith.constant 0 : i32
    %c0_i32_1 = arith.constant 0 : i32
    %c0_i32_2 = arith.constant 0 : i32
    return %c0_i32, %c0_i32_0, %c0_i32_1 : i32, i32, i32
  }
  func.func @transform_2(%arg0: i32) -> (i32, i32, i32) {
    %c0_i32 = arith.constant 0 : i32
    %c0_i32_0 = arith.constant 0 : i32
    %c0_i32_1 = arith.constant 0 : i32
    %c0_i32_2 = arith.constant 0 : i32
    return %c0_i32, %c0_i32_0, %c0_i32_1 : i32, i32, i32
  }
  func.func @transform_3(%arg0: i32) -> (i32, i32) {
    %c0_i32 = arith.constant 0 : i32
    %c0_i32_0 = arith.constant 0 : i32
    %c0_i32_1 = arith.constant 0 : i32
    return %c0_i32, %c0_i32_0 : i32, i32
  }
  func.func @transform_4(%arg0: i32) -> (i32, i32, i32) {
    %c0_i32 = arith.constant 0 : i32
    %c0_i32_0 = arith.constant 0 : i32
    %c0_i32_1 = arith.constant 0 : i32
    return %arg0, %c0_i32, %c0_i32_0 : i32, i32, i32
  }
  func.func @transform_5(%arg0: i32) -> (i32, i32, i32) {
    %c0_i32 = arith.constant 0 : i32
    %c0_i32_0 = arith.constant 0 : i32
    %c0_i32_1 = arith.constant 0 : i32
    return %arg0, %c0_i32, %c0_i32_0 : i32, i32, i32
  }
}

</mosaic_0001>

<bundles_post_ra>
// kernel: resblock_forward.3
= control target key start
LH: loop header
LB: loop body
LE: loop exit
PB: predicated region body
PF: predicated region fallthrough
CT: control target
= control target key end

     0   :  { %vm22_vm0 = vcmask 31744   ;;  %vm13_vm1 = vcmask 24576   ;;  %v263_v3 = vmov 0.0   ;;  %vm95_vm2 = vcmask 1043456   ;;  %s266_s24 = smov 4   ;;  %s351_s0 = inlined_call_operand.vmem [shape: f32[2,16,4], index: 0, kind: input, shape index: {}]   ;;  %s352_s1 = inlined_call_operand.vmem [shape: f32[12,16], index: 1, kind: input, shape index: {}]   ;;  %s353_s2 = inlined_call_operand.vmem [shape: f32[2,16,8], index: 2, kind: output, shape index: {0}]   ;;  %s354_s3 = inlined_call_operand.vmem [shape: f32[1,2,16], index: 3, kind: output, shape index: {1}]  }
   0x1   :  { %v18_v0 = vld [vmem:[%s351_s0] sm:$0xff]  ;;  %v19_v1 = vld [vmem:[%s351_s0 + $0x8] sm:$0xff]  ;;  %v20_v2 = vld [vmem:[%s351_s0 + $0x10] sm:$0xff]  ;;  %16 = vst.msk [vmem:[#allocation2 + $0x11] sm:$0x1] %vm13_vm1, %v263_v3  ;;  %vm264_vm3 = vmmov 1  }
   0x2   :  { %14 = vst.msk [vmem:[#allocation2] sm:$0x1] %vm13_vm1, %v263_v3  ;;  %15 = vst.msk [vmem:[#allocation2 + $0x18] sm:$0x1] %vm13_vm1, %v263_v3  ;;  %v21_v4 = vld [vmem:[%s351_s0 + $0x18] sm:$0xff]  ;;  %v80_v5 = vld [vmem:[%s352_s1] sm:$0xff] }
   0x3   :  { %17 = vst.msk [vmem:[#allocation2 + $0x29] sm:$0x1] %vm13_vm1, %v263_v3  ;;  %v81_v6 = vld [vmem:[%s352_s1 + $0x8] sm:$0xf]  ;;  %vm252_vm4 = vmpackc.low %vm95_vm2, %vm264_vm3  ;;  %s265_s0 = smov 8   ;;  %vm75_vm5 = vcmask 64512  }
   0x4   :  { %23 = vst.msk [vmem:[#allocation2 + $0x1] sm:$0xff] %vm22_vm0, %v18_v0  ;;  %24 = vst.msk [vmem:[#allocation2 + $0x9] sm:$0xff] %vm22_vm0, %v19_v1  ;;  %v251_v7 = vpack.c.bf16 %v81_v6, %v80_v5  ;;  %vm82_vm6 = vcmask 97280   ;;  %vm188_vm7 = vcmask 130048   ;;  %vm202_vm8 = vcmask 122880  }
   0x5   :  { %25 = vst.msk [vmem:[#allocation2 + $0x19] sm:$0xff] %vm22_vm0, %v20_v2  ;;  %26 = vst.msk [vmem:[#allocation2 + $0x21] sm:$0xff] %vm22_vm0, %v21_v4 }
   0x6   :  { %253 = vmatprep.subr.msk.bf16.mxu0 %vm252_vm4, %v251_v7  ;;  %257 = vmatprep.subr.msk.bf16.mxu1 %vm252_vm4, %v251_v7 }
   0x7   :  { %256 = vmatpush3.bf16.msk.msra.mxu0 %vm252_vm4, %v251_v7  ;;  %258 = vmatpush3.bf16.msk.msra.mxu1 %vm252_vm4, %v251_v7 }
   0xb   :  { %v35_v8 = vld [vmem:[#allocation2 + $0x2] sm:$0xff]  ;;  %v36_v13 = vld [vmem:[#allocation2 + $0xa] sm:$0xff] }
   0xc   :  { %v31_v9 = vld [vmem:[#allocation2 + $0x1] sm:$0xff]  ;;  %59 = vrot.lane.b32.xlu1 %v35_v8, %s265_s0  ;;  %v33_v10 = vld [vmem:[#allocation2 + $0x19] sm:$0xff]  ;;  %v32_v11 = vld [vmem:[#allocation2 + $0x9] sm:$0xff] }
   0xd   :  { %43 = vrot.lane.b32.xlu0 %v31_v9, %s266_s24  ;;  %v34_v12 = vld [vmem:[#allocation2 + $0x21] sm:$0xff]  ;;  %v29_v27 = vld [vmem:[#allocation2 + $0x18] sm:$0xff] }
   0xe   :  { %v38_v14 = vld [vmem:[#allocation2 + $0x22] sm:$0xff]  ;;  %v37_v15 = vld [vmem:[#allocation2 + $0x1a] sm:$0xff] }
   0xf   :  { %v27_v16 = vld [vmem:[#allocation2] sm:$0xff]  ;;  %v28_v23 = vld [vmem:[#allocation2 + $0x8] sm:$0xff] }
  0x10   :  { %47 = vrot.lane.b32.xlu1 %v33_v10, %s266_s24  ;;  %v30_v28 = vld [vmem:[#allocation2 + $0x20] sm:$0xff] }
  0x11   :  { %45 = vrot.lane.b32.xlu0 %v32_v11, %s266_s24 }
  0x14   :  { %49 = vrot.lane.b32.xlu1 %v34_v12, %s266_s24 }
  0x15   :  { %61 = vrot.lane.b32.xlu0 %v36_v13, %s265_s0 }
  0x18   :  { %65 = vrot.lane.b32.xlu1 %v38_v14, %s265_s0 }
  0x19   :  { %63 = vrot.lane.b32.xlu0 %v37_v15, %s265_s0 }
  0x7e   :  { %v60_v17 = vpop.permute.xlu1 %59 }
  0x7f   :  { %v44_v18 = vpop.permute.xlu0 %43 }
  0x80   :  { %v71_v19 = vsel %vm22_vm0, %v27_v16, %v44_v18 }
  0x81   :  { %v76_v20 = vsel %vm75_vm5, %v71_v19, %v60_v17 }
  0x82   :  { %245 = vmatprep.mubr.msk.f32.mxu0 %vm82_vm6, %v76_v20  ;;  %v48_v21 = vpop.permute.xlu1 %47 }
  0x83   :  { %v46_v22 = vpop.permute.xlu0 %45  ;;  %v73_v30 = vsel %vm22_vm0, %v29_v27, %v48_v21 }
  0x84   :  { %v72_v24 = vsel %vm22_vm0, %v28_v23, %v46_v22 }
  0x86   :  { %v50_v25 = vpop.permute.xlu1 %49 }
  0x87   :  { %v62_v26 = vpop.permute.xlu0 %61  ;;  %v74_v31 = vsel %vm22_vm0, %v30_v28, %v50_v25 }
  0x88   :  { %v77_v29 = vsel %vm75_vm5, %v72_v24, %v62_v26 }
  0x89   :  { %246 = vmatmul.mubr.msk.f32.vlgmr.msra.gmra.mrb[0].mxu0 %vm82_vm6, %v77_v29 }
  0x8a   :  { %v66_v32 = vpop.permute.xlu1 %65 }
  0x8b   :  { %v64_v33 = vpop.permute.xlu0 %63  ;;  %v79_v34 = vsel %vm75_vm5, %v74_v31, %v66_v32 }
  0x8c   :  { %v78_v35 = vsel %vm75_vm5, %v73_v30, %v64_v33 }
  0x8d   :  { %248 = vmatprep.mubr.msk.f32.mxu1 %vm82_vm6, %v78_v35 }
  0x8e   :  { %249 = vmatmul.mubr.msk.f32.vlgmr.msra.gmra.mrb[0].mxu1 %vm82_vm6, %v79_v34 }
 0x15c   :  { %v247_v36 = vpop.f32.mrb[0].mxu0 }
 0x15d   :  { %185 = vst.msk [vmem:[%s353_s2 + $0x8] sm:$0xff] %vm75_vm5, %v247_v36  ;;  %v190_v37 = vsel %vm188_vm7, %v247_v36, 0.0  ;;  %v205_v38 = vmul.f32 %v247_v36, %v247_v36  ;;  %v165_v39 = vpop.f32.mrb[1].mxu0 }
 0x15e   :  { %184 = vst.msk [vmem:[%s353_s2] sm:$0xff] %vm75_vm5, %v165_v39  ;;  %v189_v40 = vsel %vm188_vm7, %v165_v39, 0.0  ;;  %v204_v41 = vmul.f32 %v165_v39, %v165_v39 }
 0x15f   :  { %v209_v42 = vsel %vm188_vm7, %v205_v38, 0.0  ;;  %v191_v43 = vadd.f32 %v190_v37, %v189_v40 }
 0x160   :  { %v208_v44 = vsel %vm188_vm7, %v204_v41, 0.0 }
 0x161   :  { %v210_v45 = vadd.f32 %v209_v42, %v208_v44  ;;  %v250_v46 = vpop.f32.mrb[0].mxu1 }
 0x162   :  { %187 = vst.msk [vmem:[%s353_s2 + $0x18] sm:$0xff] %vm75_vm5, %v250_v46  ;;  %v175_v47 = vpop.f32.mrb[1].mxu1  ;;  %v207_v48 = vmul.f32 %v250_v46, %v250_v46  ;;  %v194_v52 = vsel %vm188_vm7, %v250_v46, 0.0 }
 0x163   :  { %186 = vst.msk [vmem:[%s353_s2 + $0x10] sm:$0xff] %vm75_vm5, %v175_v47  ;;  %v192_v49 = vsel %vm188_vm7, %v175_v47, 0.0  ;;  %v206_v50 = vmul.f32 %v175_v47, %v175_v47 }
 0x164   :  { %v193_v51 = vadd.f32 %v192_v49, %v191_v43  ;;  %v213_v56 = vsel %vm188_vm7, %v207_v48, 0.0 }
 0x165   :  { %v211_v53 = vsel %vm188_vm7, %v206_v50, 0.0 }
 0x166   :  { %v195_v54 = vadd.f32 %v194_v52, %v193_v51  ;;  %v212_v55 = vadd.f32 %v211_v53, %v210_v45 }
 0x168   :  { %v196_v57 = vrot.slane %v195_v54, 4  ;;  %v214_v58 = vadd.f32 %v213_v56, %v212_v55 }
 0x16a   :  { %v197_v59 = vadd.f32 %v196_v57, %v195_v54  ;;  %v215_v60 = vrot.slane %v214_v58, 4 }
 0x16c   :  { %v198_v61 = vrot.slane %v197_v59, 2  ;;  %v216_v62 = vadd.f32 %v215_v60, %v214_v58 }
 0x16e   :  { %v199_v63 = vadd.f32 %v198_v61, %v197_v59  ;;  %v217_v0 = vrot.slane %v216_v62, 2 }
 0x170   :  { %v200_v1 = vrot.slane %v199_v63, 1  ;;  %v218_v2 = vadd.f32 %v217_v0, %v216_v62 }
 0x172   :  { %v201_v3 = vadd.f32 %v200_v1, %v199_v63  ;;  %v219_v4 = vrot.slane %v218_v2, 1 }
 0x174   :  { %203 = vst.msk [vmem:[%s354_s3] sm:$0x1] %vm202_vm8, %v201_v3  ;;  %v220_v5 = vadd.f32 %v219_v4, %v218_v2 }
 0x176   :  { %221 = vst.msk [vmem:[%s354_s3 + $0x1] sm:$0x1] %vm202_vm8, %v220_v5 }

// kernel: resblock_forward.5
= control target key start
LH: loop header
LB: loop body
LE: loop exit
PB: predicated region body
PF: predicated region fallthrough
CT: control target
= control target key end

     0   :  { %vm70_vm0 = vcmask 1043456   ;;  %vm57_vm1 = vcmask 31744   ;;  %vm189_vm2 = vcmask 64512   ;;  %s313_s2 = inlined_call_operand.vmem [shape: f32[4,8], index: 2, kind: input, shape index: {}]   ;;  %s314_s1 = inlined_call_operand.vmem [shape: f32[2,16,4], index: 1, kind: input, shape index: {}]   ;;  %s315_s0 = inlined_call_operand.vmem [shape: f32[2,16,8], index: 0, kind: input, shape index: {}, may-alias: {0,7}]   ;;  %s316_s3 = inlined_call_operand.vmem [shape: f32[1,1,8], index: 3, kind: input, shape index: {}]   ;;  %s317_s4 = inlined_call_operand.vmem [shape: f32[1,1,8], index: 4, kind: input, shape index: {}]   ;;  %s318_s5 = inlined_call_operand.vmem [shape: f32[1,1,8], index: 5, kind: input, shape index: {}]   ;;  %s319_s6 = inlined_call_operand.vmem [shape: f32[1,1,8], index: 6, kind: input, shape index: {}]   ;;  %s320_s7 = inlined_call_operand.vmem [shape: f32[2,16,8], index: 7, kind: output, shape index: {}, may-alias: {0,7}]  }
   0x1   :  { %v56_v0 = vld [vmem:[%s313_s2] sm:$0xf]  ;;  %v54_v2 = vld [vmem:[%s314_s1 + $0x10] sm:$0xff]  ;;  %v53_v3 = vld [vmem:[%s314_s1 + $0x8] sm:$0xff] }
   0x2   :  { %v52_v1 = vld [vmem:[%s314_s1] sm:$0xff]  ;;  %212 = vmatprep.subr.msk.mxu0 %vm70_vm0, %v56_v0  ;;  %220 = vmatprep.subr.msk.mxu1 %vm70_vm0, %v56_v0  ;;  %v55_v4 = vld [vmem:[%s314_s1 + $0x18] sm:$0xff]  ;;  %v27_v5 = vld [vmem:[%s315_s0 + $0x8] sm:$0xff] }
   0x3   :  { %213 = vmatpush3.msk.msra.mxu0 %vm70_vm0, %v56_v0  ;;  %221 = vmatpush3.msk.msra.mxu1 %vm70_vm0, %v56_v0  ;;  %v198_v6 = vld [vmem:[%s316_s3] ss:$0 sm:$0xff]  ;;  %v29_v7 = vld [vmem:[%s315_s0 + $0x18] sm:$0xff]  ;;  %v28_v9 = vld [vmem:[%s315_s0 + $0x10] sm:$0xff] }
   0x4   :  { %214 = vmatprep.mubr.msk.f32.mxu0 %vm57_vm1, %v52_v1  ;;  %217 = vmatprep.mubr.msk.f32.mxu1 %vm57_vm1, %v54_v2  ;;  %v26_v8 = vld [vmem:[%s315_s0] sm:$0xff]  ;;  %v38_v10 = vmul.f32 %v198_v6, %v27_v5  ;;  %v40_v11 = vmul.f32 %v198_v6, %v29_v7  ;;  %v39_v15 = vmul.f32 %v198_v6, %v28_v9 }
   0x5   :  { %215 = vmatmul.mubr.msk.f32.vlgmr.msra.gmra.mrb[0].mxu0 %vm57_vm1, %v53_v3  ;;  %218 = vmatmul.mubr.msk.f32.vlgmr.msra.gmra.mrb[0].mxu1 %vm57_vm1, %v55_v4  ;;  %v199_v12 = vld [vmem:[%s317_s4] ss:$0 sm:$0xff]  ;;  %v37_v14 = vmul.f32 %v198_v6, %v26_v8 }
   0x6   :  { %v205_v13 = vld [vmem:[%s318_s5] ss:$0 sm:$0xff]  ;;  %v49_v19 = vadd.f32 %v199_v12, %v38_v10  ;;  %v51_v21 = vadd.f32 %v199_v12, %v40_v11  ;;  %v50_v27 = vadd.f32 %v199_v12, %v39_v15 }
   0x7   :  { %v206_v17 = vld [vmem:[%s319_s6] ss:$0 sm:$0xff]  ;;  %v48_v25 = vadd.f32 %v199_v12, %v37_v14 }
  0xd8   :  { %v216_v16 = vpop.f32.mrb[0].mxu0  ;;  %v219_v18 = vpop.f32.mrb[0].mxu1 }
  0xd9   :  { %v167_v20 = vmul.f32 %v216_v16, %v205_v13  ;;  %v169_v22 = vmul.f32 %v219_v18, %v205_v13  ;;  %v140_v23 = vpop.f32.mrb[1].mxu0  ;;  %v150_v24 = vpop.f32.mrb[1].mxu1 }
  0xda   :  { %v166_v26 = vmul.f32 %v205_v13, %v140_v23  ;;  %v168_v28 = vmul.f32 %v205_v13, %v150_v24 }
  0xdb   :  { %v178_v29 = vadd.f32 %v206_v17, %v167_v20  ;;  %v180_v30 = vadd.f32 %v206_v17, %v169_v22 }
  0xdc   :  { %v177_v31 = vadd.f32 %v206_v17, %v166_v26  ;;  %v179_v32 = vadd.f32 %v206_v17, %v168_v28 }
  0xdd   :  { %v182_v33 = vadd.f32 %v178_v29, %v49_v19  ;;  %v184_v34 = vadd.f32 %v180_v30, %v51_v21 }
  0xde   :  { %v181_v35 = vadd.f32 %v177_v31, %v48_v25  ;;  %v183_v36 = vadd.f32 %v179_v32, %v50_v27 }
  0xdf   :  { %v186_v37 = vmax.f32 %v182_v33, 0.0  ;;  %v188_v38 = vmax.f32 %v184_v34, 0.0 }
  0xe0   :  { %v185_v39 = vmax.f32 %v181_v35, 0.0  ;;  %v187_v40 = vmax.f32 %v183_v36, 0.0 }
  0xe1   :  { %191 = vst.msk [vmem:[%s320_s7 + $0x8] sm:$0xff] %vm189_vm2, %v186_v37  ;;  %193 = vst.msk [vmem:[%s320_s7 + $0x18] sm:$0xff] %vm189_vm2, %v188_v38 }
  0xe2   :  { %190 = vst.msk [vmem:[%s320_s7] sm:$0xff] %vm189_vm2, %v185_v39  ;;  %192 = vst.msk [vmem:[%s320_s7 + $0x10] sm:$0xff] %vm189_vm2, %v187_v40 }

// kernel: resblock_forward.4
= control target key start
LH: loop header
LB: loop body
LE: loop exit
PB: predicated region body
PF: predicated region fallthrough
CT: control target
= control target key end

     0   :  { %vm49_vm0 = vcmask 57344   ;;  %v293_v3 = vmov 0.0   ;;  %vm54_vm1 = vcmask 64512   ;;  %s294_s8 = smov 16   ;;  %s295_s9 = smov 8   ;;  %vm107_vm2 = vcmask 130048   ;;  %s405_s0 = inlined_call_operand.vmem [shape: f32[2,16,8], index: 0, kind: input, shape index: {}]   ;;  %s406_s1 = inlined_call_operand.vmem [shape: f32[1,1,8], index: 1, kind: input, shape index: {}]   ;;  %s407_s2 = inlined_call_operand.vmem [shape: f32[1,1,8], index: 2, kind: input, shape index: {}]   ;;  %s408_s3 = inlined_call_operand.vmem [shape: f32[24,8], index: 3, kind: input, shape index: {}]   ;;  %s409_s4 = inlined_call_operand.vmem [shape: f32[2,16,8], index: 4, kind: output, shape index: {0}]   ;;  %s410_s5 = inlined_call_operand.vmem [shape: f32[1,2,8], index: 5, kind: output, shape index: {1}]  }
   0x1   :  { %v19_v0 = vld [vmem:[%s405_s0] sm:$0xff]  ;;  %v20_v1 = vld [vmem:[%s405_s0 + $0x8] sm:$0xff]  ;;  %52 = vst.msk [vmem:[#allocation2 + $0x11] sm:$0x1] %vm49_vm0, %v293_v3  ;;  %50 = vst.msk [vmem:[#allocation2] sm:$0x1] %vm49_vm0, %v293_v3 }
   0x2   :  { %v257_v2 = vld [vmem:[%s406_s1] ss:$0 sm:$0xff]  ;;  %51 = vst.msk [vmem:[#allocation2 + $0x18] sm:$0x1] %vm49_vm0, %v293_v3  ;;  %53 = vst.msk [vmem:[#allocation2 + $0x29] sm:$0x1] %vm49_vm0, %v293_v3 }
   0x3   :  { %v30_v4 = vmul.f32 %v257_v2, %v19_v0  ;;  %v31_v5 = vmul.f32 %v257_v2, %v20_v1  ;;  %v258_v6 = vld [vmem:[%s407_s2] ss:$0 sm:$0xff]  ;;  %v21_v7 = vld [vmem:[%s405_s0 + $0x10] sm:$0xff]  ;;  %v22_v8 = vld [vmem:[%s405_s0 + $0x18] sm:$0xff]  ;;  %vm115_vm3 = vcmask 195584  }
   0x4   :  { %v32_v9 = vmul.f32 %v257_v2, %v21_v7  ;;  %v33_v10 = vmul.f32 %v257_v2, %v22_v8  ;;  %v112_v11 = vld [vmem:[%s408_s3] sm:$0xff]  ;;  %v113_v12 = vld [vmem:[%s408_s3 + $0x8] sm:$0xff]  ;;  %v114_v22 = vld [vmem:[%s408_s3 + $0x10] sm:$0xff] }
   0x5   :  { %v41_v13 = vadd.f32 %v258_v6, %v30_v4  ;;  %v42_v14 = vadd.f32 %v258_v6, %v31_v5  ;;  %v282_v15 = vpack.c.bf16 %v113_v12, %v112_v11 }
   0x6   :  { %v43_v16 = vadd.f32 %v258_v6, %v32_v9  ;;  %v44_v17 = vadd.f32 %v258_v6, %v33_v10 }
   0x7   :  { %v45_v18 = vmax.f32 %v41_v13, 0.0  ;;  %v46_v19 = vmax.f32 %v42_v14, 0.0  ;;  %283 = vmatprep.subr.bf16.mxu0 %v282_v15  ;;  %286 = vmatprep.subr.bf16.mxu1 %v282_v15 }
   0x8   :  { %v47_v20 = vmax.f32 %v43_v16, 0.0  ;;  %v48_v21 = vmax.f32 %v44_v17, 0.0  ;;  %285 = vmatpush3.bf16.msra.mxu0 %v282_v15  ;;  %288 = vmatpush3.bf16.msra.mxu1 %v282_v15 }
   0x9   :  { %55 = vst.msk [vmem:[#allocation2 + $0x1] sm:$0xff] %vm54_vm1, %v45_v18  ;;  %56 = vst.msk [vmem:[#allocation2 + $0x9] sm:$0xff] %vm54_vm1, %v46_v19  ;;  %274 = vmatprep.subr.mxu0 %v114_v22  ;;  %287 = vmatprep.subr.mxu1 %v114_v22 }
   0xa   :  { %57 = vst.msk [vmem:[#allocation2 + $0x19] sm:$0xff] %vm54_vm1, %v47_v20  ;;  %58 = vst.msk [vmem:[#allocation2 + $0x21] sm:$0xff] %vm54_vm1, %v48_v21 }
   0xc   :  { %275 = vmatpush3.msra.mxu0 %v114_v22  ;;  %289 = vmatpush3.msra.mxu1 %v114_v22 }
  0x10   :  { %v67_v23 = vld [vmem:[#allocation2 + $0x2] sm:$0xff]  ;;  %v68_v28 = vld [vmem:[#allocation2 + $0xa] sm:$0xff] }
  0x11   :  { %v63_v24 = vld [vmem:[#allocation2 + $0x1] sm:$0xff]  ;;  %91 = vrot.lane.b32.xlu1 %v67_v23, %s294_s8  ;;  %v65_v25 = vld [vmem:[#allocation2 + $0x19] sm:$0xff]  ;;  %v64_v26 = vld [vmem:[#allocation2 + $0x9] sm:$0xff] }
  0x12   :  { %75 = vrot.lane.b32.xlu0 %v63_v24, %s295_s9  ;;  %v66_v27 = vld [vmem:[#allocation2 + $0x21] sm:$0xff]  ;;  %v61_v42 = vld [vmem:[#allocation2 + $0x18] sm:$0xff] }
  0x13   :  { %v70_v29 = vld [vmem:[#allocation2 + $0x22] sm:$0xff]  ;;  %v69_v30 = vld [vmem:[#allocation2 + $0x1a] sm:$0xff] }
  0x14   :  { %v59_v31 = vld [vmem:[#allocation2] sm:$0xff]  ;;  %v60_v38 = vld [vmem:[#allocation2 + $0x8] sm:$0xff] }
  0x15   :  { %79 = vrot.lane.b32.xlu1 %v65_v25, %s295_s9  ;;  %v62_v43 = vld [vmem:[#allocation2 + $0x20] sm:$0xff] }
  0x16   :  { %77 = vrot.lane.b32.xlu0 %v64_v26, %s295_s9 }
  0x19   :  { %81 = vrot.lane.b32.xlu1 %v66_v27, %s295_s9 }
  0x1a   :  { %93 = vrot.lane.b32.xlu0 %v68_v28, %s294_s8 }
  0x1d   :  { %97 = vrot.lane.b32.xlu1 %v70_v29, %s294_s8 }
  0x1e   :  { %95 = vrot.lane.b32.xlu0 %v69_v30, %s294_s8 }
  0x83   :  { %v92_v32 = vpop.permute.xlu1 %91 }
  0x84   :  { %v76_v33 = vpop.permute.xlu0 %75 }
  0x85   :  { %v103_v34 = vsel %vm54_vm1, %v59_v31, %v76_v33 }
  0x86   :  { %v108_v35 = vsel %vm107_vm2, %v103_v34, %v92_v32 }
  0x87   :  { %276 = vmatprep.mubr.msk.f32.mxu0 %vm115_vm3, %v108_v35  ;;  %v80_v36 = vpop.permute.xlu1 %79 }
  0x88   :  { %v78_v37 = vpop.permute.xlu0 %77  ;;  %v105_v45 = vsel %vm54_vm1, %v61_v42, %v80_v36 }
  0x89   :  { %v104_v39 = vsel %vm54_vm1, %v60_v38, %v78_v37 }
  0x8b   :  { %v82_v40 = vpop.permute.xlu1 %81 }
  0x8c   :  { %v94_v41 = vpop.permute.xlu0 %93  ;;  %v106_v46 = vsel %vm54_vm1, %v62_v43, %v82_v40 }
  0x8d   :  { %v109_v44 = vsel %vm107_vm2, %v104_v39, %v94_v41 }
  0x8e   :  { %277 = vmatmul.mubr.msk.f32.vlgmr.msra.gmra.mrb[0].mxu0 %vm115_vm3, %v109_v44 }
  0x8f   :  { %v98_v47 = vpop.permute.xlu1 %97 }
  0x90   :  { %v96_v48 = vpop.permute.xlu0 %95  ;;  %v111_v49 = vsel %vm107_vm2, %v106_v46, %v98_v47 }
  0x91   :  { %v110_v50 = vsel %vm107_vm2, %v105_v45, %v96_v48 }
  0x92   :  { %279 = vmatprep.mubr.msk.f32.mxu1 %vm115_vm3, %v110_v50 }
  0x93   :  { %280 = vmatmul.mubr.msk.f32.vlgmr.msra.gmra.mrb[0].mxu1 %vm115_vm3, %v111_v49 }
 0x161   :  { %v278_v51 = vpop.f32.mrb[0].mxu0 }
 0x162   :  { %214 = vst.msk [vmem:[%s409_s4 + $0x8] sm:$0xff] %vm54_vm1, %v278_v51  ;;  %v218_v52 = vsel %vm54_vm1, %v278_v51, 0.0  ;;  %v232_v53 = vmul.f32 %v278_v51, %v278_v51  ;;  %v194_v54 = vpop.f32.mrb[1].mxu0 }
 0x163   :  { %213 = vst.msk [vmem:[%s409_s4] sm:$0xff] %vm54_vm1, %v194_v54  ;;  %v217_v55 = vsel %vm54_vm1, %v194_v54, 0.0  ;;  %v231_v56 = vmul.f32 %v194_v54, %v194_v54 }
 0x164   :  { %v236_v57 = vsel %vm54_vm1, %v232_v53, 0.0  ;;  %v219_v58 = vadd.f32 %v218_v52, %v217_v55 }
 0x165   :  { %v235_v59 = vsel %vm54_vm1, %v231_v56, 0.0 }
 0x166   :  { %v237_v60 = vadd.f32 %v236_v57, %v235_v59  ;;  %v281_v61 = vpop.f32.mrb[0].mxu1 }
 0x167   :  { %216 = vst.msk [vmem:[%s409_s4 + $0x18] sm:$0xff] %vm54_vm1, %v281_v61  ;;  %v204_v62 = vpop.f32.mrb[1].mxu1  ;;  %v234_v63 = vmul.f32 %v281_v61, %v281_v61  ;;  %v222_v3 = vsel %vm54_vm1, %v281_v61, 0.0 }
 0x168   :  { %215 = vst.msk [vmem:[%s409_s4 + $0x10] sm:$0xff] %vm54_vm1, %v204_v62  ;;  %v220_v0 = vsel %vm54_vm1, %v204_v62, 0.0  ;;  %v233_v1 = vmul.f32 %v204_v62, %v204_v62 }
 0x169   :  { %v221_v2 = vadd.f32 %v220_v0, %v219_v58  ;;  %v240_v7 = vsel %vm54_vm1, %v234_v63, 0.0 }
 0x16a   :  { %v238_v4 = vsel %vm54_vm1, %v233_v1, 0.0 }
 0x16b   :  { %v223_v5 = vadd.f32 %v222_v3, %v221_v2  ;;  %v239_v6 = vadd.f32 %v238_v4, %v237_v60 }
 0x16d   :  { %v224_v8 = vrot.slane %v223_v5, 4  ;;  %v241_v9 = vadd.f32 %v240_v7, %v239_v6 }
 0x16f   :  { %v225_v10 = vadd.f32 %v224_v8, %v223_v5  ;;  %v242_v11 = vrot.slane %v241_v9, 4 }
 0x171   :  { %v226_v12 = vrot.slane %v225_v10, 2  ;;  %v243_v13 = vadd.f32 %v242_v11, %v241_v9 }
 0x173   :  { %v227_v14 = vadd.f32 %v226_v12, %v225_v10  ;;  %v244_v15 = vrot.slane %v243_v13, 2 }
 0x175   :  { %v228_v16 = vrot.slane %v227_v14, 1  ;;  %v245_v17 = vadd.f32 %v244_v15, %v243_v13 }
 0x177   :  { %v229_v18 = vadd.f32 %v228_v16, %v227_v14  ;;  %v246_v19 = vrot.slane %v245_v17, 1 }
 0x179   :  { %230 = vst.msk [vmem:[%s410_s5] sm:$0x1] %vm49_vm0, %v229_v18  ;;  %v247_v20 = vadd.f32 %v246_v19, %v245_v17 }
 0x17b   :  { %248 = vst.msk [vmem:[%s410_s5 + $0x1] sm:$0x1] %vm49_vm0, %v247_v20 }

</bundles_post_ra>
